<compile_context>
chip_gen: v6e
topology: v6e:2x2x1
jax: 0.10.0
libtpu: 0.0.40
codegen_flags: <defaults>
</compile_context>

<pallas_src>
import jax
import jax.numpy as jnp
from jax.experimental import pallas as pl
from jax.experimental.pallas import tpu as pltpu

_C = 5.0
_MEAN = 0.0
_STD = 1.0
_SCALE = -_C / (2.0 * _STD * _STD)          # = -2.5

_LANES = 128                                # vreg lane width
_TARGET_BLOCK_BYTES = 2 << 20               # ~2 MiB per buffer per grid step


def _gaussian_kernel(x_ref, o_ref):
    x = x_ref[...].astype(jnp.float32)
    if _MEAN != 0.0:                         # folded at trace time (mean == 0)
        x = x - _MEAN
    # exp on EUP, muls on VPU -- both free filler; kernel is HBM-bound.
    o_ref[...] = jnp.exp(_SCALE * x * x).astype(o_ref.dtype)


def _gaussian_ref_math(x):
    xf = x.astype(jnp.float32)
    d = xf - _MEAN
    return jnp.exp(_SCALE * d * d).astype(x.dtype)


def gaussian(x):
    """Elementwise Gaussian activation via a Pallas TPU kernel.

    Matches torch_gaussian(x, c=5, mean=0, std=1). Non-float inputs are cast
    to float32; float inputs keep their dtype.
    """
    orig_shape = x.shape
    if not jnp.issubdtype(x.dtype, jnp.floating):
        x = x.astype(jnp.float32)
    dtype = x.dtype
    itemsize = jnp.dtype(dtype).itemsize

    flat = x.reshape(-1)                    # free for contiguous inputs
    n = flat.shape[0]
    if n == 0:
        return flat.reshape(orig_shape)

    # Split into a 128-lane-aligned main part (Pallas) and a tiny tail (<128
    # elements, plain jnp) -- avoids padding/unpadding full-array copies.
    n_main = (n // _LANES) * _LANES
    tail = n - n_main

    parts = []
    if n_main:
        main = flat if tail == 0 else flat[:n_main]
        rows = n_main // _LANES
        slab = main.reshape(rows, _LANES)

        # ~2 MiB per buffer: 4096 rows for f32, 8192 for bf16, 16384 for 8-bit.
        # All multiples of 32, so packed (16,128)/(32,128) sublane tiles align.
        full_tile = max(8, _TARGET_BLOCK_BYTES // (_LANES * itemsize))
        if rows <= full_tile:
            row_tile = rows                 # block == full array dim (always legal)
        else:
            row_tile = full_tile            # ragged last block masked by Pallas
        grid = (pl.cdiv(rows, row_tile),)

        out = pl.pallas_call(
            _gaussian_kernel,
            out_shape=jax.ShapeDtypeStruct((rows, _LANES), dtype),
            grid_spec=pltpu.PrefetchScalarGridSpec(
                num_scalar_prefetch=0,
                grid=grid,
                in_specs=[pl.BlockSpec((row_tile, _LANES), lambda i: (i, 0))],
                out_specs=pl.BlockSpec((row_tile, _LANES), lambda i: (i, 0)),
            ),
            compiler_params=pltpu.CompilerParams(
                dimension_semantics=("parallel",),
                vmem_limit_bytes=32 << 20,   # headroom; stays under v7x physical
            ),
            cost_estimate=pl.CostEstimate(
                flops=3 * n_main,
                transcendentals=n_main,
                bytes_accessed=2 * n_main * itemsize,
            ),
        )(slab)
        parts.append(out.reshape(-1))

    if tail:
        # TODO(synk): tail (<128 elems) handled with plain jnp.exp, not Pallas.
        parts.append(_gaussian_ref_math(flat[n_main:]))

    out_flat = parts[0] if len(parts) == 1 else jnp.concatenate(parts)
    return out_flat.reshape(orig_shape)


if __name__ == "__main__":
    key = jax.random.PRNGKey(0)

    # Primary input: NCHW conv-style activation, batch=2, channels=4, 16x16.
    x = jax.random.normal(key, (2, 4, 16, 16), dtype=jnp.float32)
    y = jax.block_until_ready(gaussian(x))
    ref = _gaussian_ref_math(x)
    assert y.shape == x.shape and y.dtype == x.dtype
    assert jnp.max(jnp.abs(y - ref)) < 1e-6

    # Exercise the other code paths (all small):
    #  - multi-block grid path
    x_big = jax.random.normal(jax.random.PRNGKey(1), (4, 32, 64, 64), dtype=jnp.float32)
    y_big = jax.block_until_ready(gaussian(x_big))
    assert jnp.max(jnp.abs(y_big - _gaussian_ref_math(x_big))) < 1e-6
    #  - non-lane-aligned size (main prefix + tail)
    x_odd = jax.random.normal(jax.random.PRNGKey(2), (2, 3, 100), dtype=jnp.float32)
    y_odd = jax.block_until_ready(gaussian(x_odd))
    assert jnp.max(jnp.abs(y_odd - _gaussian_ref_math(x_odd))) < 1e-6
    #  - tiny tail-only size
    x_tiny = jax.random.normal(jax.random.PRNGKey(3), (3, 5, 7), dtype=jnp.float32)
    y_tiny = jax.block_until_ready(gaussian(x_tiny))
    assert jnp.max(jnp.abs(y_tiny - _gaussian_ref_math(x_tiny))) < 1e-6
    #  - bf16 dtype path
    x_bf = jax.random.normal(jax.random.PRNGKey(4), (2, 4, 16, 16)).astype(jnp.bfloat16)
    y_bf = jax.block_until_ready(gaussian(x_bf))
    assert y_bf.dtype == jnp.bfloat16
    assert jnp.max(jnp.abs(y_bf.astype(jnp.float32)
                           - _gaussian_ref_math(x_bf).astype(jnp.float32))) < 1e-2

    print("KERNEL_OK")
</pallas_src>

<mosaic_0001>
module attributes {stable_mosaic.version = 11 : i64} {
  func.func @_gaussian_kernel(%arg0: i32, %arg1: memref<16x128xf32, #tpu.memory_space<vmem>>, %arg2: memref<16x128xf32, #tpu.memory_space<vmem>>) attributes {dimension_semantics = [#tpu.dimension_semantics<parallel>], iteration_bounds = array<i64: 1>, scalar_prefetch = 0 : i64, scratch_operands = 0 : i64, tpu.core_type = #tpu.core_type<tc>, window_params = [{transform_indices = @transform_0, window_bounds = array<i64: 16, 128>}, {transform_indices = @transform_1, window_bounds = array<i64: 16, 128>}]} {
    %c0 = arith.constant 0 : index
    %c0_0 = arith.constant 0 : index
    %0 = vector.load %arg1[%c0, %c0_0] : memref<16x128xf32, #tpu.memory_space<vmem>>, vector<16x128xf32>
    %cst = arith.constant -2.500000e+00 : f32
    %1 = vector.broadcast %cst : f32 to vector<16x128xf32>
    %2 = arith.mulf %1, %0 : vector<16x128xf32>
    %3 = arith.mulf %2, %0 : vector<16x128xf32>
    %4 = math.exp %3 : vector<16x128xf32>
    %c0_1 = arith.constant 0 : index
    %c0_2 = arith.constant 0 : index
    %5 = vector.load %arg2[%c0_1, %c0_2] : memref<16x128xf32, #tpu.memory_space<vmem>>, vector<16x128xf32>
    tpu.vector_store %arg2[%c0_1, %c0_2], %4 {strides = array<i32>} : memref<16x128xf32, #tpu.memory_space<vmem>>, vector<16x128xf32>,
    return
  }
  func.func @transform_0(%arg0: i32) -> (i32, i32) {
    %c0_i32 = arith.constant 0 : i32
    %c0_i32_0 = arith.constant 0 : i32
    return %arg0, %c0_i32 : i32, i32
  }
  func.func @transform_1(%arg0: i32) -> (i32, i32) {
    %c0_i32 = arith.constant 0 : i32
    %c0_i32_0 = arith.constant 0 : i32
    return %arg0, %c0_i32 : i32, i32
  }
}

</mosaic_0001>

<bundles_post_ra>
// kernel: tpu_custom_call.1
= control target key start
LH: loop header
LB: loop body
LE: loop exit
PB: predicated region body
PF: predicated region fallthrough
CT: control target
= control target key end

     0   :  { %6 = vsyncpa [#allocation3], 0  ;;  %s130_s0 = inlined_call_operand.hbm [shape: f32[16,128], index: 0, kind: input, shape index: {}]   ;;  %s131_s1 = inlined_call_operand.hbm [shape: f32[16,128], index: 1, kind: output, shape index: {}]  }
   0x1   :  { %7 = vsyncpa [#allocation4], 0  ;;  %s104_s6 = smov [#allocation2]  }
   0x2   :  { %s13_s7 = sshll.u32 %s104_s6, 4  ;;  %s14_s7 = int_to_ptr.vmem [resolvable:$true] %s13_s7 }
   0x3   :  { %s68_s8 = scalar_lea.vmem %s14_s7, 256  ;;  %p73_p1 = scmp.lt.s32.totalorder %s14_s7, %s14_s7 }
   0x4   :  { %p69_p0 = scmp.ne.s32.totalorder %s14_s7, %s68_s8  ;;  %p74_p2 = scmp.lt.s32.totalorder %s68_s8, %s68_s8 }
   0x6   :  { %p75_p3 = por %p74_p2, %p73_p1 }
   0x8   :  { %p76_p4 = pnand %p75_p3, %p69_p0 }
   0xa   :  { %79 = shalt.err (!%p76_p4)
}
   0xb   :  { %s105_s9 = smov 128   ;;  %s106_s10 = smov 8  }
   0xc   :  { %19 = dma.hbm_to_vmem [thread:$0]  %s130_s0, 256, %s14_s7, [#allocation3], %s105_s9, %s105_s9, %s106_s10  }
   0xd   :  { %100 = dma.done.wait [#allocation3], 256  }
   0xe   :  { %101 = vsyncadd [#allocation3], 4294967040  ;;  %v23_v0 = vld [vmem:[#allocation2] sm:$0xff]  ;;  %v24_v1 = vld [vmem:[#allocation2 + $0x8] sm:$0xff]  ;;  %s107_s13 = smov [#allocation5]  }
   0xf   :  { %v25_v2 = vmul.f32 -2.5, %v23_v0  ;;  %v26_v3 = vmul.f32 -2.5, %v24_v1  ;;  %s40_s14 = sshll.u32 %s107_s13, 4  ;;  %s41_s14 = int_to_ptr.vmem [resolvable:$true] %s40_s14 }
  0x10   :  { %s80_s0 = scalar_lea.vmem %s41_s14, 256  ;;  %p85_p6 = scmp.lt.s32.totalorder %s41_s14, %s41_s14 }
  0x11   :  { %v27_v4 = vmul.f32 %v25_v2, %v23_v0  ;;  %v28_v5 = vmul.f32 %v26_v3, %v24_v1  ;;  %p81_p5 = scmp.ne.s32.totalorder %s41_s14, %s80_s0  ;;  %p86_p7 = scmp.lt.s32.totalorder %s80_s0, %s80_s0 }
  0x13   :  { %v29_v6 = vmul.f32 1.442695, %v27_v4  ;;  %v31_v7 = vmul.f32 1.442695, %v28_v5  ;;  %p87_p8 = por %p86_p7, %p85_p6 }
  0x15   :  { %56 = vpow2.f32 %v29_v6  ;;  %p88_p9 = pnand %p87_p8, %p81_p5 }
  0x16   :  { %58 = vpow2.f32 %v31_v7 }
  0x22   :  { %v57_v8 = vpop.eup %56 }
  0x23   :  { %v59_v9 = vpop.eup %58  ;;  %33 = vst [vmem:[#allocation5] sm:$0xff] %v57_v8 }
  0x24   :  { %34 = vst [vmem:[#allocation5 + $0x8] sm:$0xff] %v59_v9 }
  0x25   :  { %91 = shalt.err (!%p88_p9)
}
  0x26   :  { %46 = dma.vmem_to_hbm [thread:$0]  %s41_s14, 256, %s131_s1, [#allocation4], %s105_s9, %s105_s9, %s106_s10  }
  0x27   :  { %102 = dma.done.wait [#allocation4], 256  }
  0x28   :  { %103 = vsyncadd [#allocation4], 4294967040 }
  0x29   :  { %50 = vsyncpa [#allocation3], 1 }
  0x2a   :  { %51 = vsyncpa [#allocation4], 1 }

</bundles_post_ra>
